<compile_context>
chip_gen: v7x
topology: tpu7x:2x2x1
jax: 0.10.0
libtpu: 0.0.40
codegen_flags: <defaults>
</compile_context>

<pallas_src>
import functools

import jax
import jax.numpy as jnp
from jax import lax
from jax.experimental import pallas as pl
from jax.experimental.pallas import tpu as pltpu


# ----------------------------------------------------------------------------
# Kernel: per-tile partial sum of label-smoothed negative log-likelihood
# ----------------------------------------------------------------------------
def _smooth_ce_kernel(pred_ref, gold_ref, loss_ref, *, eps, n_class, n_rows,
                      tile_rows):
    # pred_ref: (TM, C) logits (native dtype); gold_ref: (TM, 1) i32
    # loss_ref: (1, 8, 128) f32  -- per-tile partial sum, broadcast-filled.
    logits = pred_ref[...].astype(jnp.float32)
    gold = gold_ref[...]                                        # (TM, 1) int32

    # Numerically stable log_softmax over the class (lane) axis.
    m = jnp.max(logits, axis=-1, keepdims=True)
    z = logits - m
    lse = jnp.log(jnp.sum(jnp.exp(z), axis=-1, keepdims=True))
    log_prb = z - lse                                           # (TM, C)

    # one_hot via iota compare (no scatter needed), then label smoothing.
    cls = lax.broadcasted_iota(jnp.int32, logits.shape, 1)      # (TM, C)
    one_hot = (cls == gold).astype(jnp.float32)
    off = eps / (n_class - 1) if n_class > 1 else 0.0
    smoothed = one_hot * (1.0 - eps) + (1.0 - one_hot) * off

    per_row = -jnp.sum(smoothed * log_prb, axis=-1, keepdims=True)  # (TM, 1)

    # Mask rows past the true extent BEFORE the partial reduction (ragged
    # last tile reads padded garbage that could be non-finite).
    row = (pl.program_id(0) * tile_rows
           + lax.broadcasted_iota(jnp.int32, per_row.shape, 0))
    per_row = jnp.where(row < n_rows, per_row, 0.0)

    partial = jnp.sum(per_row)                                  # scalar
    loss_ref[...] = jnp.broadcast_to(partial, loss_ref.shape)


# ----------------------------------------------------------------------------
# Wrapper: mirrors get_loss.forward(pred, gold, smoothing=True)
# ----------------------------------------------------------------------------
def get_loss(pred, gold, smoothing=True, *, block_rows=4096):
    """pred: (M, n_class) logits (any float dtype); gold: M int labels."""
    M, C = pred.shape
    gold2 = gold.reshape(-1).astype(jnp.int32).reshape(M, 1)    # gold.view(-1)

    eps = 0.2 if smoothing else 0.0                             # eps=0 == plain CE

    # Row tile: full extent if it fits, else a multiple of the sublane pack
    # (16 for 16-bit logits, 8 otherwise).
    sub = 16 if jnp.dtype(pred.dtype).itemsize == 2 else 8
    tm = min(block_rows, M)
    if tm < M:
        tm = max(sub, (tm // sub) * sub)
    n_tiles = pl.cdiv(M, tm)

    partials = pl.pallas_call(
        functools.partial(_smooth_ce_kernel, eps=float(eps), n_class=C,
                          n_rows=M, tile_rows=tm),
        out_shape=jax.ShapeDtypeStruct((n_tiles, 8, 128), jnp.float32),
        grid=(n_tiles,),
        in_specs=[pl.BlockSpec((tm, C), lambda i: (i, 0)),
                  pl.BlockSpec((tm, 1), lambda i: (i, 0))],
        out_specs=pl.BlockSpec((1, 8, 128), lambda i: (i, 0, 0)),
        compiler_params=pltpu.CompilerParams(
            dimension_semantics=("parallel",)),
    )(pred, gold2)

    # One scalar per tile -> final mean over all M rows.
    return jnp.sum(partials[:, 0, 0]) / M


# ----------------------------------------------------------------------------
# Pure-JAX reference (for correctness check only)
# ----------------------------------------------------------------------------
def _ref_loss(pred, gold, smoothing=True):
    gold = gold.reshape(-1)
    logp = jax.nn.log_softmax(pred.astype(jnp.float32), axis=1)
    M, C = pred.shape
    if smoothing:
        eps = 0.2
        oh = jax.nn.one_hot(gold, C, dtype=jnp.float32)
        oh = oh * (1.0 - eps) + (1.0 - oh) * eps / (C - 1)
        return -(oh * logp).sum(axis=1).mean()
    return -jnp.take_along_axis(logp, gold[:, None], axis=1).mean()


if __name__ == "__main__":
    key = jax.random.PRNGKey(0)
    B, N, num_classes = 2, 64, 13                               # pred is (B*N, C)
    k1, k2 = jax.random.split(key)
    pred = jax.random.normal(k1, (B * N, num_classes), jnp.float32)
    gold = jax.random.randint(k2, (B, N), 0, num_classes, dtype=jnp.int32)

    # smoothing=True (module default), single-tile path.
    loss = jax.block_until_ready(get_loss(pred, gold, smoothing=True))
    ref = _ref_loss(pred, gold, smoothing=True)
    assert loss.shape == ()
    assert bool(jnp.isfinite(loss))
    assert bool(jnp.allclose(loss, ref, rtol=1e-5, atol=1e-5))

    # smoothing=False path (== F.cross_entropy reduction='mean')
    loss_ce = jax.block_until_ready(get_loss(pred, gold, smoothing=False))
    ref_ce = _ref_loss(pred, gold, smoothing=False)
    assert bool(jnp.allclose(loss_ce, ref_ce, rtol=1e-5, atol=1e-5))

    # Native bf16 logits (no wrapper f32 copy), multi-tile grid with a ragged
    # last tile to exercise the row mask + in-kernel partial reduction.
    k3, k4 = jax.random.split(k2)
    M2 = 600
    pred2 = jax.random.normal(k3, (M2, num_classes), jnp.float32)
    pred2_bf16 = pred2.astype(jnp.bfloat16)
    gold2 = jax.random.randint(k4, (M2,), 0, num_classes, dtype=jnp.int32)
    loss2 = jax.block_until_ready(get_loss(pred2_bf16, gold2, smoothing=True,
                                           block_rows=256))
    ref2 = _ref_loss(pred2_bf16.astype(jnp.float32), gold2, smoothing=True)
    assert bool(jnp.allclose(loss2, ref2, rtol=1e-4, atol=1e-4))

    print("KERNEL_OK")
</pallas_src>

<mosaic_0001>
module attributes {stable_mosaic.version = 11 : i64} {
  func.func @_smooth_ce_kernel(%arg0: i32, %arg1: memref<128x13xf32, #tpu.memory_space<vmem>>, %arg2: memref<128x1xi32, #tpu.memory_space<vmem>>, %arg3: memref<1x8x128xf32, #tpu.memory_space<vmem>>) attributes {dimension_semantics = [#tpu.dimension_semantics<parallel>], iteration_bounds = array<i64: 1>, scalar_prefetch = 0 : i64, scratch_operands = 0 : i64, tpu.core_type = #tpu.core_type<tc>, window_params = [{transform_indices = @transform_0, window_bounds = array<i64: 128, 13>}, {transform_indices = @transform_1, window_bounds = array<i64: 128, 1>}, {transform_indices = @transform_2, window_bounds = array<i64: 1, 8, 128>}]} {
    %c0 = arith.constant 0 : index
    %c0_0 = arith.constant 0 : index
    %0 = vector.load %arg1[%c0, %c0_0] : memref<128x13xf32, #tpu.memory_space<vmem>>, vector<128x13xf32>
    %c0_1 = arith.constant 0 : index
    %c0_2 = arith.constant 0 : index
    %1 = vector.load %arg2[%c0_1, %c0_2] : memref<128x1xi32, #tpu.memory_space<vmem>>, vector<128x1xi32>
    %cst = arith.constant dense<0xFF800000> : vector<128xf32>
    %2 = vector.multi_reduction <maximumf>, %0, %cst [1] : vector<128x13xf32> to vector<128xf32>
    %3 = vector.shape_cast %2 : vector<128xf32> to vector<128x1xf32>
    %4 = vector.broadcast %3 : vector<128x1xf32> to vector<128x13xf32>
    %5 = arith.subf %0, %4 : vector<128x13xf32>
    %6 = math.exp %5 : vector<128x13xf32>
    %cst_3 = arith.constant dense<0.000000e+00> : vector<128xf32>
    %7 = vector.multi_reduction <add>, %6, %cst_3 [1] : vector<128x13xf32> to vector<128xf32>
    %8 = vector.shape_cast %7 : vector<128xf32> to vector<128x1xf32>
    %9 = math.log %8 : vector<128x1xf32>
    %10 = vector.broadcast %9 : vector<128x1xf32> to vector<128x13xf32>
    %11 = arith.subf %5, %10 : vector<128x13xf32>
    %12 = tpu.iota {dimensions = array<i32: 1>} : vector<128x13xi32>
    %13 = vector.broadcast %1 : vector<128x1xi32> to vector<128x13xi32>
    %14 = arith.cmpi eq, %12, %13 : vector<128x13xi32>
    %15 = arith.extui %14 : vector<128x13xi1> to vector<128x13xi32>
    %16 = arith.sitofp %15 : vector<128x13xi32> to vector<128x13xf32>
    %cst_4 = arith.constant 8.000000e-01 : f32
    %17 = vector.broadcast %cst_4 : f32 to vector<128x13xf32>
    %18 = arith.mulf %16, %17 : vector<128x13xf32>
    %cst_5 = arith.constant 1.000000e+00 : f32
    %19 = vector.broadcast %cst_5 : f32 to vector<128x13xf32>
    %20 = arith.subf %19, %16 : vector<128x13xf32>
    %cst_6 = arith.constant 0.0166666675 : f32
    %21 = vector.broadcast %cst_6 : f32 to vector<128x13xf32>
    %22 = arith.mulf %20, %21 : vector<128x13xf32>
    %23 = arith.addf %18, %22 : vector<128x13xf32>
    %24 = arith.mulf %23, %11 : vector<128x13xf32>
    %cst_7 = arith.constant dense<0.000000e+00> : vector<128xf32>
    %25 = vector.multi_reduction <add>, %24, %cst_7 [1] : vector<128x13xf32> to vector<128xf32>
    %26 = vector.shape_cast %25 : vector<128xf32> to vector<128x1xf32>
    %cst_8 = arith.constant 0.000000e+00 : f32
    %27 = vector.broadcast %cst_8 : f32 to vector<128x1xf32>
    %28 = arith.subf %27, %26 : vector<128x1xf32>
    %c128_i32 = arith.constant 128 : i32
    %29 = arith.muli %arg0, %c128_i32 : i32
    %30 = tpu.iota {dimensions = array<i32: 0>} : vector<128x1xi32>
    %31 = vector.broadcast %29 : i32 to vector<128x1xi32>
    %32 = arith.addi %31, %30 : vector<128x1xi32>
    %c128_i32_9 = arith.constant 128 : i32
    %33 = vector.broadcast %c128_i32_9 : i32 to vector<128x1xi32>
    %34 = arith.cmpi slt, %32, %33 : vector<128x1xi32>
    %cst_10 = arith.constant 0.000000e+00 : f32
    %35 = vector.broadcast %cst_10 : f32 to vector<128x1xf32>
    %36 = arith.select %34, %28, %35 : vector<128x1xi1>, vector<128x1xf32>
    %37 = vector.shape_cast %36 : vector<128x1xf32> to vector<1x128x1xf32>
    %cst_11 = arith.constant dense<0.000000e+00> : vector<1xf32>
    %38 = vector.multi_reduction <add>, %37, %cst_11 [1, 2] : vector<1x128x1xf32> to vector<1xf32>
    %39 = vector.shape_cast %38 : vector<1xf32> to vector<1x1x1xf32>
    %40 = vector.extract %39[0, 0, 0] : f32 from vector<1x1x1xf32>
    %41 = vector.broadcast %40 : f32 to vector<1x8x128xf32>
    %c0_12 = arith.constant 0 : index
    %c0_13 = arith.constant 0 : index
    %c0_14 = arith.constant 0 : index
    %42 = vector.load %arg3[%c0_12, %c0_13, %c0_14] : memref<1x8x128xf32, #tpu.memory_space<vmem>>, vector<1x8x128xf32>
    tpu.vector_store %arg3[%c0_12, %c0_13, %c0_14], %41 {strides = array<i32>} : memref<1x8x128xf32, #tpu.memory_space<vmem>>, vector<1x8x128xf32>,
    return
  }
  func.func @transform_0(%arg0: i32) -> (i32, i32) {
    %c0_i32 = arith.constant 0 : i32
    %c0_i32_0 = arith.constant 0 : i32
    return %arg0, %c0_i32 : i32, i32
  }
  func.func @transform_1(%arg0: i32) -> (i32, i32) {
    %c0_i32 = arith.constant 0 : i32
    %c0_i32_0 = arith.constant 0 : i32
    return %arg0, %c0_i32 : i32, i32
  }
  func.func @transform_2(%arg0: i32) -> (i32, i32, i32) {
    %c0_i32 = arith.constant 0 : i32
    %c0_i32_0 = arith.constant 0 : i32
    %c0_i32_1 = arith.constant 0 : i32
    return %arg0, %c0_i32, %c0_i32_0 : i32, i32, i32
  }
}

</mosaic_0001>

<bundles_post_ra>
// kernel: tpu_custom_call.1
= control target key start
LH: loop header
LB: loop body
LE: loop exit
PB: predicated region body
PF: predicated region fallthrough
CT: control target
= control target key end

     0   :  { %vm44_vm0 = vcmask 105472   ;;  %s1052_s0 = inlined_call_operand.vmem [shape: f32[128,13], index: 0, kind: input, shape index: {}]   ;;  %s1053_s1 = inlined_call_operand.vmem [shape: s32[128,1], index: 1, kind: input, shape index: {}]   ;;  %s1054_s2 = inlined_call_operand.hbm [shape: f32[1,8,128], index: 2, kind: output, shape index: {}]  }
   0x1   :  { %v12_v0 = vld [vmem:[%s1052_s0] sm:$0xff]  ;;  %v14_v1 = vld [vmem:[%s1052_s0 + $0x10] sm:$0xff]  ;;  %v13_v2 = vld [vmem:[%s1052_s0 + $0x8] sm:$0xff] }
   0x2   :  { %v45_v3 = vsel %vm44_vm0, %v12_v0, -inf  ;;  %v51_v4 = vsel %vm44_vm0, %v14_v1, -inf  ;;  %v15_v5 = vld [vmem:[%s1052_s0 + $0x18] sm:$0xff]  ;;  %v48_v6 = vsel %vm44_vm0, %v13_v2, -inf  ;;  %v16_v8 = vld [vmem:[%s1052_s0 + $0x20] sm:$0xff]  ;;  %v17_v9 = vld [vmem:[%s1052_s0 + $0x28] sm:$0xff] }
   0x3   :  { %46 = vmax.xlane.f32.xlu0 %v45_v3  ;;  %52 = vmax.xlane.f32.xlu1 %v51_v4  ;;  %v54_v7 = vsel %vm44_vm0, %v15_v5, -inf }
   0x4   :  { %7 = vsyncpa [#allocation3], 0  ;;  %v57_v10 = vsel %vm44_vm0, %v16_v8, -inf  ;;  %v60_v11 = vsel %vm44_vm0, %v17_v9, -inf  ;;  %v18_v12 = vld [vmem:[%s1052_s0 + $0x30] sm:$0xff]  ;;  %v19_v13 = vld [vmem:[%s1052_s0 + $0x38] sm:$0xff] }
   0x5   :  { %v63_v14 = vsel %vm44_vm0, %v18_v12, -inf  ;;  %v66_v15 = vsel %vm44_vm0, %v19_v13, -inf  ;;  %v767_v16 = vld [vmem:[%s1052_s0 + $0x40] sm:$0xff]  ;;  %v772_v17 = vld [vmem:[%s1052_s0 + $0x48] sm:$0xff]  ;;  %v781_v20 = vld [vmem:[%s1052_s0 + $0x50] sm:$0xff]  ;;  %v714_v32 = vmov 0  }
   0x6   :  { %v69_v18 = vsel %vm44_vm0, %v767_v16, -inf  ;;  %v72_v19 = vsel %vm44_vm0, %v772_v17, -inf  ;;  %v786_v21 = vld [vmem:[%s1052_s0 + $0x58] sm:$0xff]  ;;  %v75_v22 = vsel %vm44_vm0, %v781_v20, -inf  ;;  %v795_v24 = vld [vmem:[%s1052_s0 + $0x60] sm:$0xff]  ;;  %v800_v25 = vld [vmem:[%s1052_s0 + $0x68] sm:$0xff]  ;;  %624 = vset.pattern.permute.xlu1 %v714_v32  ;;  %625 = vset.pattern.permute.xlu0 %v714_v32 }
   0x7   :  { %49 = vmax.xlane.f32.xlu0 %v48_v6  ;;  %55 = vmax.xlane.f32.xlu1 %v54_v7  ;;  %v78_v23 = vsel %vm44_vm0, %v786_v21, -inf  ;;  %v81_v26 = vsel %vm44_vm0, %v795_v24, -inf  ;;  %v84_v27 = vsel %vm44_vm0, %v800_v25, -inf  ;;  %v809_v28 = vld [vmem:[%s1052_s0 + $0x70] sm:$0xff]  ;;  %v814_v29 = vld [vmem:[%s1052_s0 + $0x78] sm:$0xff] }
   0x8   :  { %v87_v30 = vsel %vm44_vm0, %v809_v28, -inf  ;;  %v90_v31 = vsel %vm44_vm0, %v814_v29, -inf }
   0xb   :  { %58 = vmax.xlane.f32.xlu0 %v57_v10  ;;  %61 = vmax.xlane.f32.xlu1 %v60_v11 }
   0xf   :  { %64 = vmax.xlane.f32.xlu0 %v63_v14  ;;  %67 = vmax.xlane.f32.xlu1 %v66_v15 }
  0x13   :  { %70 = vmax.xlane.f32.xlu0 %v69_v18  ;;  %73 = vmax.xlane.f32.xlu1 %v72_v19 }
  0x17   :  { %76 = vmax.xlane.f32.xlu0 %v75_v22  ;;  %79 = vmax.xlane.f32.xlu1 %v78_v23 }
  0x1b   :  { %82 = vmax.xlane.f32.xlu0 %v81_v26  ;;  %85 = vmax.xlane.f32.xlu1 %v84_v27 }
  0x1f   :  { %88 = vmax.xlane.f32.xlu0 %v87_v30  ;;  %91 = vmax.xlane.f32.xlu1 %v90_v31 }
  0x90   :  { %v47_v33 = vpop.xlane.xlu0 %46  ;;  %v53_v34 = vpop.xlane.xlu1 %52 }
  0x91   :  { %v820_v35 = vsub.f32 %v12_v0, %v47_v33  ;;  %v822_v36 = vsub.f32 %v14_v1, %v53_v34 }
  0x93   :  { %v109_v37 = vmul.f32 1.442695, %v820_v35  ;;  %v113_v38 = vmul.f32 1.442695, %v822_v36 }
  0x94   :  { %v50_v39 = vpop.xlane.xlu0 %49  ;;  %v56_v40 = vpop.xlane.xlu1 %55 }
  0x95   :  { %626 = vpow2.f32 %v109_v37  ;;  %v826_v41 = vsub.f32 %v13_v2, %v50_v39  ;;  %v828_v42 = vsub.f32 %v15_v5, %v56_v40 }
  0x96   :  { %628 = vpow2.f32 %v113_v38 }
  0x97   :  { %v111_v43 = vmul.f32 1.442695, %v826_v41  ;;  %v115_v44 = vmul.f32 1.442695, %v828_v42 }
  0x98   :  { %v59_v45 = vpop.xlane.xlu0 %58  ;;  %v62_v46 = vpop.xlane.xlu1 %61 }
  0x99   :  { %630 = vpow2.f32 %v111_v43  ;;  %v832_v47 = vsub.f32 %v16_v8, %v59_v45  ;;  %v834_v48 = vsub.f32 %v17_v9, %v62_v46 }
  0x9a   :  { %632 = vpow2.f32 %v115_v44 }
  0x9b   :  { %v117_v49 = vmul.f32 1.442695, %v832_v47  ;;  %v119_v50 = vmul.f32 1.442695, %v834_v48 }
  0x9c   :  { %v65_v51 = vpop.xlane.xlu0 %64  ;;  %v68_v52 = vpop.xlane.xlu1 %67 }
  0x9d   :  { %634 = vpow2.f32 %v117_v49  ;;  %v838_v53 = vsub.f32 %v18_v12, %v65_v51  ;;  %v840_v54 = vsub.f32 %v19_v13, %v68_v52  ;;  %v28_v51 = vld [vmem:[%s1053_s1] sm:$0xff]  ;;  %v31_v52 = vld [vmem:[%s1053_s1 + $0x18] sm:$0xff] }
  0x9e   :  { %636 = vpow2.f32 %v119_v50 }
  0x9f   :  { %v627_v55 = vpop.eup %626  ;;  %v121_v56 = vmul.f32 1.442695, %v838_v53  ;;  %v123_v57 = vmul.f32 1.442695, %v840_v54 }
  0xa0   :  { %v629_v58 = vpop.eup %628  ;;  %v71_v59 = vpop.xlane.xlu0 %70  ;;  %v141_v60 = vsel %vm44_vm0, %v627_v55, 0.0  ;;  %v29_v55 = vld [vmem:[%s1053_s1 + $0x8] sm:$0xff] }
  0xa1   :  { %v74_v61 = vpop.xlane.xlu1 %73  ;;  %638 = vpow2.f32 %v121_v56  ;;  %v846_v62 = vsub.f32 %v767_v16, %v71_v59  ;;  %142 = vadd.xlane.f32.xlu0 %v141_v60  ;;  %v147_v0 = vsel %vm44_vm0, %v629_v58, 0.0  ;;  %v33_v56 = vld [vmem:[%s1053_s1 + $0x28] sm:$0xff]  ;;  %v35_v58 = vld [vmem:[%s1053_s1 + $0x38] sm:$0xff]  ;;  %v32_v59 = vld [vmem:[%s1053_s1 + $0x20] sm:$0xff] }
  0xa2   :  { %v849_v63 = vsub.f32 %v772_v17, %v74_v61  ;;  %640 = vpow2.f32 %v123_v57  ;;  %v30_v57 = vld [vmem:[%s1053_s1 + $0x10] sm:$0xff]  ;;  %v36_v61 = vld [vmem:[%s1053_s1 + $0x40] sm:$0xff] }
  0xa3   :  { %v631_v1 = vpop.eup %630  ;;  %v125_v2 = vmul.f32 1.442695, %v846_v62  ;;  %v34_v60 = vld [vmem:[%s1053_s1 + $0x30] sm:$0xff] }
  0xa4   :  { %v127_v3 = vmul.f32 1.442695, %v849_v63  ;;  %v633_v4 = vpop.eup %632  ;;  %v77_v5 = vpop.xlane.xlu0 %76  ;;  %v144_v6 = vsel %vm44_vm0, %v631_v1, 0.0  ;;  %v37_v1 = vld [vmem:[%s1053_s1 + $0x48] sm:$0xff] }
  0xa5   :  { %v80_v7 = vpop.xlane.xlu1 %79  ;;  %642 = vpow2.f32 %v125_v2  ;;  %v856_v8 = vsub.f32 %v781_v20, %v77_v5  ;;  %148 = vadd.xlane.f32.xlu0 %v147_v0  ;;  %145 = vadd.xlane.f32.xlu1 %v144_v6  ;;  %v150_v10 = vsel %vm44_vm0, %v633_v4, 0.0  ;;  %v40_v5 = vld [vmem:[%s1053_s1 + $0x60] sm:$0xff]  ;;  %v41_v6 = vld [vmem:[%s1053_s1 + $0x68] sm:$0xff] }
  0xa6   :  { %v859_v9 = vsub.f32 %v786_v21, %v80_v7  ;;  %644 = vpow2.f32 %v127_v3  ;;  %v39_v3 = vld [vmem:[%s1053_s1 + $0x58] sm:$0xff] }
  0xa7   :  { %v635_v11 = vpop.eup %634  ;;  %v129_v12 = vmul.f32 1.442695, %v856_v8 }
  0xa8   :  { %v131_v13 = vmul.f32 1.442695, %v859_v9  ;;  %v637_v14 = vpop.eup %636  ;;  %v83_v15 = vpop.xlane.xlu0 %82  ;;  %v153_v16 = vsel %vm44_vm0, %v635_v11, 0.0  ;;  %v38_v11 = vld [vmem:[%s1053_s1 + $0x50] sm:$0xff] }
  0xa9   :  { %v86_v17 = vpop.xlane.xlu1 %85  ;;  %646 = vpow2.f32 %v129_v12  ;;  %v866_v18 = vsub.f32 %v795_v24, %v83_v15  ;;  %151 = vadd.xlane.f32.xlu1 %v150_v10  ;;  %154 = vadd.xlane.f32.xlu0 %v153_v16  ;;  %v156_v20 = vsel %vm44_vm0, %v637_v14, 0.0  ;;  %v43_v12 = vld [vmem:[%s1053_s1 + $0x78] sm:$0xff] }
  0xaa   :  { %v869_v19 = vsub.f32 %v800_v25, %v86_v17  ;;  %648 = vpow2.f32 %v131_v13 }
  0xab   :  { %v639_v21 = vpop.eup %638  ;;  %v133_v22 = vmul.f32 1.442695, %v866_v18 }
  0xac   :  { %v135_v23 = vmul.f32 1.442695, %v869_v19  ;;  %v641_v26 = vpop.eup %640  ;;  %v89_v27 = vpop.xlane.xlu0 %88  ;;  %v159_v30 = vsel %vm44_vm0, %v639_v21, 0.0 }
  0xad   :  { %650 = vpow2.f32 %v133_v22  ;;  %v876_v24 = vsub.f32 %v809_v28, %v89_v27  ;;  %157 = vadd.xlane.f32.xlu1 %v156_v20  ;;  %160 = vadd.xlane.f32.xlu0 %v159_v30  ;;  %v162_v25 = vsel %vm44_vm0, %v641_v26, 0.0  ;;  %v92_v0 = vpop.xlane.xlu1 %91 }
  0xae   :  { %652 = vpow2.f32 %v135_v23  ;;  %v918_v2 = vsub.f32 %v814_v29, %v92_v0  ;;  %v42_v29 = vld [vmem:[%s1053_s1 + $0x70] sm:$0xff]  ;;  %s716_s1 = smov [#allocation2]  }
  0xaf   :  { %v643_v31 = vpop.eup %642  ;;  %v137_v32 = vmul.f32 1.442695, %v876_v24  ;;  %s595_s15 = sshll.u32 %s716_s1, 4  ;;  %s596_s15 = int_to_ptr.vmem [resolvable:$true] %s595_s15 }
  0xb0   :  { %v645_v33 = vpop.eup %644  ;;  %v165_v34 = vsel %vm44_vm0, %v643_v31, 0.0  ;;  %v139_v4 = vmul.f32 1.442695, %v918_v2  ;;  %s690_s17 = scalar_lea.vmem %s596_s15, 128  ;;  %p695_p1 = scmp.lt.s32.totalorder %s596_s15, %s596_s15 }
  0xb1   :  { %654 = vpow2.f32 %v137_v32  ;;  %163 = vadd.xlane.f32.xlu1 %v162_v25  ;;  %166 = vadd.xlane.f32.xlu0 %v165_v34  ;;  %v168_v37 = vsel %vm44_vm0, %v645_v33, 0.0  ;;  %v237_v25 = vlaneseq  ;;  %p691_p0 = scmp.ne.s32.totalorder %s596_s15, %s690_s17  ;;  %p696_p2 = scmp.lt.s32.totalorder %s690_s17, %s690_s17 }
  0xb2   :  { %656 = vpow2.f32 %v139_v4 }
  0xb3   :  { %v647_v38 = vpop.eup %646  ;;  %v948_v33 = vand.u32 127, %v237_v25  ;;  %p697_p3 = por %p696_p2, %p695_p1 }
  0xb4   :  { %v649_v39 = vpop.eup %648  ;;  %v171_v28 = vsel %vm44_vm0, %v647_v38, 0.0 }
  0xb5   :  { %169 = vadd.xlane.f32.xlu1 %v168_v37  ;;  %172 = vadd.xlane.f32.xlu0 %v171_v28  ;;  %v174_v40 = vsel %vm44_vm0, %v649_v39, 0.0  ;;  %p698_p4 = pnand %p697_p3, %p691_p0 }
  0xb7   :  { %v651_v43 = vpop.eup %650 }
  0xb8   :  { %v653_v44 = vpop.eup %652  ;;  %v177_v45 = vsel %vm44_vm0, %v651_v43, 0.0 }
  0xb9   :  { %175 = vadd.xlane.f32.xlu1 %v174_v40  ;;  %178 = vadd.xlane.f32.xlu0 %v177_v45  ;;  %v180_v46 = vsel %vm44_vm0, %v653_v44, 0.0  ;;  %v715_v40 = vmov 0.0  }
  0xbb   :  { %v655_v49 = vpop.eup %654 }
  0xbc   :  { %v183_v50 = vsel %vm44_vm0, %v655_v49, 0.0  ;;  %v657_v7 = vpop.eup %656 }
  0xbd   :  { %181 = vadd.xlane.f32.xlu1 %v180_v46  ;;  %184 = vadd.xlane.f32.xlu0 %v183_v50  ;;  %v186_v10 = vsel %vm44_vm0, %v657_v7, 0.0 }
  0xce   :  { %240 = vperm.xlu1 %624, %v28_v51  }
  0xd2   :  { %249 = vperm.xlu1 %624, %v31_v52  }
  0xd3   :  { %243 = vperm.xlu0 %625, %v29_v55  }
  0xd6   :  { %255 = vperm.xlu1 %624, %v33_v56  }
  0xd7   :  { %246 = vperm.xlu0 %625, %v30_v57  }
  0xda   :  { %261 = vperm.xlu1 %624, %v35_v58  }
  0xdb   :  { %252 = vperm.xlu0 %625, %v32_v59  }
  0xdf   :  { %258 = vperm.xlu0 %625, %v34_v60  }
  0xe3   :  { %264 = vperm.xlu0 %625, %v36_v61  }
  0xe7   :  { %267 = vperm.xlu0 %625, %v37_v1  }
  0xeb   :  { %273 = vperm.xlu0 %625, %v39_v3  }
  0xef   :  { %276 = vperm.xlu0 %625, %v40_v5  }
  0xf3   :  { %279 = vperm.xlu0 %625, %v41_v6  }
  0xf7   :  { %282 = vperm.xlu0 %625, %v42_v29  }
  0xfe   :  { %187 = vadd.xlane.f32.xlu1 %v186_v10 }
 0x10f   :  { %270 = vperm.xlu1 %624, %v38_v11  }
 0x113   :  { %285 = vperm.xlu1 %624, %v43_v12  }
 0x12e   :  { %v143_v13 = vpop.xlane.xlu0 %142 }
 0x12f   :  { %658 = vlog2.f32 %v143_v13 }
 0x132   :  { %v146_v14 = vpop.xlane.xlu1 %145  ;;  %v149_v15 = vpop.xlane.xlu0 %148 }
 0x133   :  { %660 = vlog2.f32 %v146_v14 }
 0x134   :  { %662 = vlog2.f32 %v149_v15 }
 0x136   :  { %v152_v16 = vpop.xlane.xlu1 %151  ;;  %v155_v17 = vpop.xlane.xlu0 %154 }
 0x137   :  { %664 = vlog2.f32 %v152_v16 }
 0x138   :  { %666 = vlog2.f32 %v155_v17 }
 0x139   :  { %v659_v34 = vpop.eup %658 }
 0x13a   :  { %v158_v20 = vpop.xlane.xlu1 %157  ;;  %v161_v21 = vpop.xlane.xlu0 %160  ;;  %v190_v45 = vmul.f32 0.6931472, %v659_v34 }
 0x13b   :  { %668 = vlog2.f32 %v158_v20 }
 0x13c   :  { %670 = vlog2.f32 %v161_v21  ;;  %v221_v4 = vsub.f32 %v820_v35, %v190_v45 }
 0x13d   :  { %v661_v39 = vpop.eup %660 }
 0x13e   :  { %v164_v22 = vpop.xlane.xlu1 %163  ;;  %v167_v23 = vpop.xlane.xlu0 %166  ;;  %v192_v46 = vmul.f32 0.6931472, %v661_v39 }
 0x13f   :  { %v663_v28 = vpop.eup %662  ;;  %672 = vlog2.f32 %v164_v22 }
 0x140   :  { %v954_v51 = vmul.f32 0.6931472, %v663_v28  ;;  %674 = vlog2.f32 %v167_v23  ;;  %v222_v6 = vsub.f32 %v826_v41, %v192_v46 }
 0x141   :  { %v665_v55 = vpop.eup %664 }
 0x142   :  { %v170_v26 = vpop.xlane.xlu1 %169  ;;  %v940_v27 = vpop.xlane.xlu0 %172  ;;  %v196_v29 = vmul.f32 0.6931472, %v665_v55  ;;  %v223_v10 = vsub.f32 %v822_v36, %v954_v51 }
 0x143   :  { %v667_v59 = vpop.eup %666  ;;  %676 = vlog2.f32 %v170_v26 }
 0x144   :  { %v198_v11 = vmul.f32 0.6931472, %v667_v59  ;;  %v224_v28 = vsub.f32 %v828_v42, %v196_v29 }
 0x145   :  { %v669_v16 = vpop.eup %668 }
 0x146   :  { %v942_v30 = vpop.xlane.xlu1 %175  ;;  %v944_v31 = vpop.xlane.xlu0 %178 }
 0x147   :  { %v671_v26 = vpop.eup %670  ;;  %678 = vlog2.f32 %v942_v30 }
 0x148   :  { %v202_v59 = vmul.f32 0.6931472, %v671_v26 }
 0x14a   :  { %v946_v32 = vpop.xlane.xlu1 %181  ;;  %v950_v37 = vpop.xlane.xlu0 %184 }
 0x14b   :  { %680 = vlog2.f32 %v946_v32 }
 0x14c   :  { %682 = vlog2.f32 %v940_v27 }
 0x14d   :  { %684 = vlog2.f32 %v944_v31 }
 0x14e   :  { %v241_v38 = vpop.permute.xlu1 %240  ;;  %686 = vlog2.f32 %v950_v37 }
 0x14f   :  { %vm287_vm1 = vcmp.eq.s32.totalorder %v948_v33, %v241_v38 }
 0x150   :  { %v603_v43 = vsel %vm287_vm1, 1.0, %v715_v40 }
 0x151   :  { %v351_v44 = vsub.f32 1.0, %v603_v43  ;;  %v335_v56 = vmul.f32 0.8, %v603_v43  ;;  %v200_v43 = vmul.f32 0.6931472, %v669_v16  ;;  %v227_v16 = vsub.f32 %v838_v53, %v202_v59 }
 0x152   :  { %v250_v49 = vpop.permute.xlu1 %249  ;;  %v244_v50 = vpop.permute.xlu0 %243 }
 0x153   :  { %v367_v52 = vmul.f32 0.016666668, %v351_v44  ;;  %vm290_vm2 = vcmp.eq.s32.totalorder %v948_v33, %v250_v49  ;;  %vm288_vm3 = vcmp.eq.s32.totalorder %v948_v33, %v244_v50 }
 0x154   :  { %v606_v57 = vsel %vm290_vm2, 1.0, %v715_v40  ;;  %v604_v58 = vsel %vm288_vm3, 1.0, %v715_v40  ;;  %vm546_vm2 = vcmask 7168  }
 0x155   :  { %v354_v60 = vsub.f32 1.0, %v606_v57  ;;  %v336_v61 = vmul.f32 0.8, %v604_v58  ;;  %v352_v0 = vsub.f32 1.0, %v604_v58  ;;  %v383_v5 = vadd.f32 %v367_v52, %v335_v56  ;;  %v673_v56 = vpop.eup %672 }
 0x156   :  { %v256_v1 = vpop.permute.xlu1 %255  ;;  %v247_v3 = vpop.permute.xlu0 %246  ;;  %v338_v36 = vmul.f32 0.8, %v606_v57  ;;  %v225_v58 = vsub.f32 %v832_v47, %v198_v11 }
 0x157   :  { %v368_v7 = vmul.f32 0.016666668, %v352_v0  ;;  %vm292_vm4 = vcmp.eq.s32.totalorder %v948_v33, %v256_v1  ;;  %vm289_vm5 = vcmp.eq.s32.totalorder %v948_v33, %v247_v3  ;;  %v399_v13 = vmul.f32 %v383_v5, %v221_v4  ;;  %v675_v42 = vpop.eup %674 }
 0x158   :  { %v608_v12 = vsel %vm292_vm4, 1.0, %v715_v40  ;;  %v370_v14 = vmul.f32 0.016666668, %v354_v60  ;;  %v605_v35 = vsel %vm289_vm5, 1.0, %v715_v40  ;;  %v226_v5 = vsub.f32 %v834_v48, %v200_v43 }
 0x159   :  { %v384_v15 = vadd.f32 %v368_v7, %v336_v61  ;;  %v356_v41 = vsub.f32 1.0, %v608_v12  ;;  %v337_v17 = vmul.f32 0.8, %v605_v35  ;;  %v353_v20 = vsub.f32 1.0, %v605_v35 }
 0x15a   :  { %v262_v21 = vpop.permute.xlu1 %261  ;;  %v415_v22 = vsel %vm44_vm0, %v399_v13, 0.0  ;;  %v253_v23 = vpop.permute.xlu0 %252  ;;  %v386_v46 = vadd.f32 %v370_v14, %v338_v36  ;;  %v340_v60 = vmul.f32 0.8, %v608_v12  ;;  %v204_v35 = vmul.f32 0.6931472, %v673_v56 }
 0x15b   :  { %vm294_vm6 = vcmp.eq.s32.totalorder %v948_v33, %v262_v21  ;;  %416 = vadd.xlane.f32.xlu0 %v415_v22  ;;  %vm291_vm7 = vcmp.eq.s32.totalorder %v948_v33, %v253_v23  ;;  %v400_v25 = vmul.f32 %v384_v15, %v222_v6  ;;  %v369_v34 = vmul.f32 0.016666668, %v353_v20  ;;  %v677_v14 = vpop.eup %676 }
 0x15c   :  { %v610_v38 = vsel %vm294_vm6, 1.0, %v715_v40  ;;  %v607_v39 = vsel %vm291_vm7, 1.0, %v715_v40  ;;  %v372_v49 = vmul.f32 0.016666668, %v356_v41  ;;  %v402_v7 = vmul.f32 %v386_v46, %v224_v28  ;;  %v679_v28 = vpop.eup %678 }
 0x15d   :  { %v339_v44 = vmul.f32 0.8, %v607_v39  ;;  %v355_v45 = vsub.f32 1.0, %v607_v39  ;;  %v358_v50 = vsub.f32 1.0, %v610_v38  ;;  %v418_v51 = vsel %vm44_vm0, %v400_v25, 0.0 }
 0x15e   :  { %v259_v52 = vpop.permute.xlu0 %258  ;;  %v385_v55 = vadd.f32 %v369_v34, %v337_v17  ;;  %419 = vadd.xlane.f32.xlu1 %v418_v51  ;;  %v388_v13 = vadd.f32 %v372_v49, %v340_v60  ;;  %v206_v12 = vmul.f32 0.6931472, %v675_v42  ;;  %v424_v21 = vsel %vm44_vm0, %v402_v7, 0.0 }
 0x15f   :  { %v371_v57 = vmul.f32 0.016666668, %v355_v45  ;;  %vm293_vm8 = vcmp.eq.s32.totalorder %v948_v33, %v259_v52  ;;  %v374_v6 = vmul.f32 0.016666668, %v358_v50  ;;  %v208_v34 = vmul.f32 0.6931472, %v677_v14 }
 0x160   :  { %v609_v61 = vsel %vm293_vm8, 1.0, %v715_v40  ;;  %v401_v0 = vmul.f32 %v385_v55, %v223_v10  ;;  %v342_v10 = vmul.f32 0.8, %v610_v38  ;;  %v404_v23 = vmul.f32 %v388_v13, %v226_v5 }
 0x161   :  { %v341_v1 = vmul.f32 0.8, %v609_v61  ;;  %v357_v3 = vsub.f32 1.0, %v609_v61  ;;  %v387_v4 = vadd.f32 %v371_v57, %v339_v44  ;;  %v228_v38 = vsub.f32 %v840_v54, %v204_v35 }
 0x162   :  { %v421_v30 = vsel %vm44_vm0, %v401_v0, 0.0  ;;  %v265_v29 = vpop.permute.xlu0 %264  ;;  %v390_v36 = vadd.f32 %v374_v6, %v342_v10  ;;  %v229_v39 = vsub.f32 %v846_v62, %v206_v12  ;;  %v430_v32 = vsel %vm44_vm0, %v404_v23, 0.0 }
 0x163   :  { %v373_v47 = vmul.f32 0.016666668, %v357_v3  ;;  %422 = vadd.xlane.f32.xlu0 %v421_v30  ;;  %vm295_vm9 = vcmp.eq.s32.totalorder %v948_v33, %v265_v29  ;;  %v403_v11 = vmul.f32 %v387_v4, %v225_v58  ;;  %v212_v55 = vmul.f32 0.6931472, %v679_v28 }
 0x164   :  { %v611_v15 = vsel %vm295_vm9, 1.0, %v715_v40  ;;  %v406_v50 = vmul.f32 %v390_v36, %v228_v38  ;;  %v230_v62 = vsub.f32 %v849_v63, %v208_v34 }
 0x165   :  { %v343_v48 = vmul.f32 0.8, %v611_v15  ;;  %v359_v41 = vsub.f32 1.0, %v611_v15  ;;  %v427_v17 = vsel %vm44_vm0, %v403_v11, 0.0  ;;  %v389_v20 = vadd.f32 %v373_v47, %v341_v1  ;;  %v681_v1 = vpop.eup %680 }
 0x166   :  { %428 = vadd.xlane.f32.xlu1 %v427_v17  ;;  %v268_v22 = vpop.permute.xlu0 %267  ;;  %v436_v59 = vsel %vm44_vm0, %v406_v50, 0.0  ;;  %v232_v4 = vsub.f32 %v859_v9, %v212_v55  ;;  %v216_v29 = vmul.f32 0.6931472, %v681_v1 }
 0x167   :  { %v375_v25 = vmul.f32 0.016666668, %v359_v41  ;;  %425 = vadd.xlane.f32.xlu0 %v424_v21  ;;  %vm296_vm10 = vcmp.eq.s32.totalorder %v948_v33, %v268_v22  ;;  %v405_v26 = vmul.f32 %v389_v20, %v227_v16 }
 0x168   :  { %v612_v53 = vsel %vm296_vm10, 1.0, %v715_v40  ;;  %v234_v47 = vsub.f32 %v869_v19, %v216_v29  ;;  %v683_v19 = vpop.eup %682 }
 0x169   :  { %v344_v43 = vmul.f32 0.8, %v612_v53  ;;  %v360_v44 = vsub.f32 1.0, %v612_v53  ;;  %v433_v45 = vsel %vm44_vm0, %v405_v26, 0.0  ;;  %v391_v46 = vadd.f32 %v375_v25, %v343_v48  ;;  %v685_v20 = vpop.eup %684 }
 0x16a   :  { %434 = vadd.xlane.f32.xlu1 %v433_v45  ;;  %v274_v49 = vpop.permute.xlu0 %273  ;;  %v210_v27 = vmul.f32 0.6931472, %v683_v19  ;;  %v214_v36 = vmul.f32 0.6931472, %v685_v20  ;;  %v687_v26 = vpop.eup %686 }
 0x16b   :  { %v376_v51 = vmul.f32 0.016666668, %v360_v44  ;;  %431 = vadd.xlane.f32.xlu0 %v430_v32  ;;  %vm298_vm11 = vcmp.eq.s32.totalorder %v948_v33, %v274_v49  ;;  %v407_v52 = vmul.f32 %v391_v46, %v229_v39  ;;  %v218_v32 = vmul.f32 0.6931472, %v687_v26 }
 0x16c   :  { %v614_v54 = vsel %vm298_vm11, 1.0, %v715_v40  ;;  %v231_v39 = vsub.f32 %v856_v8, %v210_v27  ;;  %v233_v50 = vsub.f32 %v866_v18, %v214_v36 }
 0x16d   :  { %v346_v56 = vmul.f32 0.8, %v614_v54  ;;  %v362_v57 = vsub.f32 1.0, %v614_v54  ;;  %v439_v58 = vsel %vm44_vm0, %v407_v52, 0.0  ;;  %v392_v42 = vadd.f32 %v376_v51, %v344_v43 }
 0x16e   :  { %440 = vadd.xlane.f32.xlu1 %v439_v58  ;;  %v277_v60 = vpop.permute.xlu0 %276  ;;  %v235_v58 = vsub.f32 %v876_v24, %v218_v32 }
 0x16f   :  { %v378_v61 = vmul.f32 0.016666668, %v362_v57  ;;  %437 = vadd.xlane.f32.xlu0 %v436_v59  ;;  %v408_v0 = vmul.f32 %v392_v42, %v230_v62  ;;  %vm299_vm13 = vcmp.eq.s32.totalorder %v948_v33, %v277_v60 }
 0x170   :  { %v615_v15 = vsel %vm299_vm13, 1.0, %v715_v40 }
 0x171   :  { %v442_v3 = vsel %vm44_vm0, %v408_v0, 0.0  ;;  %v394_v5 = vadd.f32 %v378_v61, %v346_v56  ;;  %v363_v48 = vsub.f32 1.0, %v615_v15  ;;  %v347_v21 = vmul.f32 0.8, %v615_v15 }
 0x172   :  { %v280_v6 = vpop.permute.xlu0 %279 }
 0x173   :  { %443 = vadd.xlane.f32.xlu0 %v442_v3  ;;  %vm300_vm12 = vcmp.eq.s32.totalorder %v948_v33, %v280_v6  ;;  %v410_v63 = vmul.f32 %v394_v5, %v232_v4  ;;  %v379_v22 = vmul.f32 0.016666668, %v363_v48 }
 0x174   :  { %v616_v30 = vsel %vm300_vm12, 1.0, %v715_v40 }
 0x175   :  { %v348_v7 = vmul.f32 0.8, %v616_v30  ;;  %v364_v13 = vsub.f32 1.0, %v616_v30  ;;  %v448_v14 = vsel %vm44_vm0, %v410_v63, 0.0  ;;  %v395_v46 = vadd.f32 %v379_v22, %v347_v21 }
 0x176   :  { %v283_v10 = vpop.permute.xlu0 %282 }
 0x177   :  { %v380_v35 = vmul.f32 0.016666668, %v364_v13  ;;  %449 = vadd.xlane.f32.xlu0 %v448_v14  ;;  %vm301_vm14 = vcmp.eq.s32.totalorder %v948_v33, %v283_v10 }
 0x178   :  { %v617_v41 = vsel %vm301_vm14, 1.0, %v715_v40 }
 0x179   :  { %v396_v11 = vadd.f32 %v380_v35, %v348_v7  ;;  %v365_v37 = vsub.f32 1.0, %v617_v41  ;;  %v349_v51 = vmul.f32 0.8, %v617_v41 }
 0x17b   :  { %v412_v12 = vmul.f32 %v396_v11, %v234_v47  ;;  %v381_v43 = vmul.f32 0.016666668, %v365_v37 }
 0x17d   :  { %v454_v9 = vsel %vm44_vm0, %v412_v12, 0.0  ;;  %v397_v8 = vadd.f32 %v381_v43, %v349_v51 }
 0x17e   :  { %455 = vadd.xlane.f32.xlu0 %v454_v9 }
 0x17f   :  { %v413_v18 = vmul.f32 %v397_v8, %v235_v58 }
 0x181   :  { %v457_v60 = vsel %vm44_vm0, %v413_v18, 0.0 }
 0x18b   :  { %v188_v16 = vpop.xlane.xlu1 %187 }
 0x18c   :  { %688 = vlog2.f32 %v188_v16 }
 0x18f   :  { %v271_v17 = vpop.permute.xlu1 %270 }
 0x190   :  { %vm297_vm15 = vcmp.eq.s32.totalorder %v948_v33, %v271_v17 }
 0x191   :  { %v613_v31 = vsel %vm297_vm15, 1.0, %v715_v40 }
 0x192   :  { %v361_v23 = vsub.f32 1.0, %v613_v31  ;;  %v345_v34 = vmul.f32 0.8, %v613_v31 }
 0x193   :  { %v286_v25 = vpop.permute.xlu1 %285 }
 0x194   :  { %v377_v53 = vmul.f32 0.016666668, %v361_v23  ;;  %vm302_vm1 = vcmp.eq.s32.totalorder %v948_v33, %v286_v25 }
 0x195   :  { %v618_v38 = vsel %vm302_vm1, 1.0, %v715_v40  ;;  %v411_v40 = vmul.f32 %v395_v46, %v233_v50 }
 0x196   :  { %v689_v28 = vpop.eup %688  ;;  %v366_v44 = vsub.f32 1.0, %v618_v38  ;;  %v393_v45 = vadd.f32 %v377_v53, %v345_v34  ;;  %v350_v52 = vmul.f32 0.8, %v618_v38 }
 0x197   :  { %v220_v49 = vmul.f32 0.6931472, %v689_v28  ;;  %v451_v42 = vsel %vm44_vm0, %v411_v40, 0.0 }
 0x198   :  { %v382_v55 = vmul.f32 0.016666668, %v366_v44  ;;  %v409_v54 = vmul.f32 %v393_v45, %v231_v39 }
 0x199   :  { %v236_v62 = vsub.f32 %v918_v2, %v220_v49 }
 0x19a   :  { %v445_v33 = vsel %vm44_vm0, %v409_v54, 0.0  ;;  %v398_v56 = vadd.f32 %v382_v55, %v350_v52 }
 0x19b   :  { %446 = vadd.xlane.f32.xlu1 %v445_v33 }
 0x19c   :  { %v414_v57 = vmul.f32 %v398_v56, %v236_v62 }
 0x19e   :  { %v460_v59 = vsel %vm44_vm0, %v414_v57, 0.0 }
 0x19f   :  { %452 = vadd.xlane.f32.xlu1 %v451_v42  ;;  %461 = vadd.xlane.f32.xlu0 %v460_v59 }
 0x1a3   :  { %458 = vadd.xlane.f32.xlu1 %v457_v60 }
 0x1e8   :  { %v417_v2 = vpop.xlane.xlu0 %416 }
 0x1e9   :  { %v463_v4 = vsub.f32 0.0, %v417_v2 }
 0x1eb   :  { %v420_v0 = vpop.xlane.xlu1 %419  ;;  %v547_v63 = vsel %vm546_vm2, %v463_v4, 0.0 }
 0x1ec   :  { %v464_v1 = vsub.f32 0.0, %v420_v0 }
 0x1ee   :  { %v548_v24 = vsel %vm546_vm2, %v464_v1, 0.0 }
 0x1ef   :  { %v549_v29 = vadd.f32 %v548_v24, %v547_v63 }
 0x1f0   :  { %v423_v61 = vpop.xlane.xlu0 %422 }
 0x1f1   :  { %v465_v5 = vsub.f32 0.0, %v423_v61 }
 0x1f3   :  { %v550_v30 = vsel %vm546_vm2, %v465_v5, 0.0  ;;  %v429_v7 = vpop.xlane.xlu1 %428 }
 0x1f4   :  { %v426_v3 = vpop.xlane.xlu0 %425  ;;  %v551_v14 = vadd.f32 %v550_v30, %v549_v29  ;;  %v467_v47 = vsub.f32 0.0, %v429_v7 }
 0x1f5   :  { %v466_v6 = vsub.f32 0.0, %v426_v3 }
 0x1f6   :  { %v554_v9 = vsel %vm546_vm2, %v467_v47, 0.0 }
 0x1f7   :  { %v552_v13 = vsel %vm546_vm2, %v466_v6, 0.0  ;;  %v435_v10 = vpop.xlane.xlu1 %434 }
 0x1f8   :  { %v432_v35 = vpop.xlane.xlu0 %431  ;;  %v553_v11 = vadd.f32 %v552_v13, %v551_v14  ;;  %v469_v48 = vsub.f32 0.0, %v435_v10 }
 0x1f9   :  { %v468_v12 = vsub.f32 0.0, %v432_v35 }
 0x1fa   :  { %v555_v15 = vadd.f32 %v554_v9, %v553_v11  ;;  %v558_v20 = vsel %vm546_vm2, %v469_v48, 0.0 }
 0x1fb   :  { %v556_v16 = vsel %vm546_vm2, %v468_v12, 0.0  ;;  %v441_v27 = vpop.xlane.xlu1 %440 }
 0x1fc   :  { %v438_v19 = vpop.xlane.xlu0 %437  ;;  %v557_v41 = vadd.f32 %v556_v16, %v555_v15  ;;  %v471_v37 = vsub.f32 0.0, %v441_v27 }
 0x1fd   :  { %v470_v17 = vsub.f32 0.0, %v438_v19 }
 0x1fe   :  { %v559_v31 = vadd.f32 %v558_v20, %v557_v41  ;;  %v562_v25 = vsel %vm546_vm2, %v471_v37, 0.0 }
 0x1ff   :  { %v560_v21 = vsel %vm546_vm2, %v470_v17, 0.0 }
 0x200   :  { %v444_v22 = vpop.xlane.xlu0 %443  ;;  %v561_v23 = vadd.f32 %v560_v21, %v559_v31 }
 0x201   :  { %v472_v36 = vsub.f32 0.0, %v444_v22 }
 0x202   :  { %v563_v26 = vadd.f32 %v562_v25, %v561_v23 }
 0x203   :  { %v564_v53 = vsel %vm546_vm2, %v472_v36, 0.0 }
 0x204   :  { %v450_v34 = vpop.xlane.xlu0 %449  ;;  %v565_v43 = vadd.f32 %v564_v53, %v563_v26 }
 0x205   :  { %v474_v39 = vsub.f32 0.0, %v450_v34 }
 0x207   :  { %v568_v49 = vsel %vm546_vm2, %v474_v39, 0.0 }
 0x20b   :  { %v456_v44 = vpop.xlane.xlu0 %455 }
 0x20c   :  { %v476_v50 = vsub.f32 0.0, %v456_v44 }
 0x20e   :  { %v572_v40 = vsel %vm546_vm2, %v476_v50, 0.0 }
 0x228   :  { %v447_v38 = vpop.xlane.xlu1 %446 }
 0x229   :  { %v473_v28 = vsub.f32 0.0, %v447_v38 }
 0x22b   :  { %v566_v45 = vsel %vm546_vm2, %v473_v28, 0.0 }
 0x22c   :  { %v567_v46 = vadd.f32 %v566_v45, %v565_v43  ;;  %v453_v32 = vpop.xlane.xlu1 %452  ;;  %v462_v55 = vpop.xlane.xlu0 %461 }
 0x22d   :  { %v475_v51 = vsub.f32 0.0, %v453_v32  ;;  %v478_v56 = vsub.f32 0.0, %v462_v55 }
 0x22e   :  { %v569_v52 = vadd.f32 %v568_v49, %v567_v46 }
 0x22f   :  { %v570_v54 = vsel %vm546_vm2, %v475_v51, 0.0  ;;  %v576_v59 = vsel %vm546_vm2, %v478_v56, 0.0 }
 0x230   :  { %v571_v62 = vadd.f32 %v570_v54, %v569_v52  ;;  %v459_v33 = vpop.xlane.xlu1 %458 }
 0x231   :  { %v477_v8 = vsub.f32 0.0, %v459_v33 }
 0x232   :  { %v573_v57 = vadd.f32 %v572_v40, %v571_v62 }
 0x233   :  { %v574_v58 = vsel %vm546_vm2, %v477_v8, 0.0 }
 0x234   :  { %v575_v42 = vadd.f32 %v574_v58, %v573_v57 }
 0x236   :  { %v577_v18 = vadd.f32 %v576_v59, %v575_v42 }
 0x238   :  { %578 = vadd.xlane.f32.xlu1 %v577_v18 }
 0x2c5   :  { %v579_v60 = vpop.xlane.xlu1 %578 }
 0x2c6   :  { %v580_v2 = vrot.slane %v579_v60, 4 }
 0x2c8   :  { %v581_v61 = vadd.f32 %v580_v2, %v579_v60 }
 0x2ca   :  { %v582_v0 = vrot.slane %v581_v61, 2 }
 0x2cc   :  { %v583_v1 = vadd.f32 %v582_v0, %v581_v61 }
 0x2ce   :  { %v584_v3 = vrot.slane %v583_v1, 1 }
 0x2d0   :  { %v585_v4 = vadd.f32 %v584_v3, %v583_v1 }
 0x2d2   :  { %619 = vpush %v585_v4 }
 0x303   :  { %s620_s16 = spop %619 }
 0x304   :  { %v587_v5 = vstv %s620_s16 }
 0x305   :  { %588 = vst [vmem:[#allocation2] sm:$0xff] %v587_v5 }
 0x306   :  { %701 = shalt.err (!%p698_p4)
}
 0x307   :  { %s702_s20 = scalar_lea.hbm %s1054_s2, 128 }
 0x308   :  { %p703_p5 = scmp.ne.s32.totalorder %s1054_s2, %s702_s20  ;;  %p706_p6 = scmp.lt.u32.totalorder %s702_s20, %s1054_s2 }
 0x30a   :  { %p708_p7 = pnand %p706_p6, %p703_p5 }
 0x30c   :  { %711 = shalt.err (!%p708_p7)
}
 0x30d   :  { %598 = dma.vmem_to_hbm [thread:$0]  %s596_s15, 128, %s1054_s2, [#allocation3]  }
 0x30e   :  { %712 = dma.done.wait [#allocation3], 128  }
 0x30f   :  { %713 = vsyncadd [#allocation3], 4294967168 }
 0x310   :  { %602 = vsyncpa [#allocation3], 1 }

</bundles_post_ra>
